<compile_context>
chip_gen: v5e
topology: v5e:2x2
jax: 0.10.0
libtpu: 0.0.40
codegen_flags: <defaults>
</compile_context>

<pallas_src>
import numpy as np
import jax
import jax.numpy as jnp
from jax.experimental import pallas as pl
from jax.experimental.pallas import tpu as pltpu

# ----- EEGNet hyper-parameters (PyTorch defaults of the reference module) -----
N_CHANNELS = 4        # EEG electrodes  -> conv "height"
SAMPLES    = 32       # time samples    -> conv "width"
N_CLASSES  = 10
F1, D, F2  = 8, 2, 16
K1, K3     = 8, 16    # temporal kernel lengths (block1 / block2 depthwise)
HIDDEN     = 128
BN_EPS     = 1e-5

F12        = F1 * D               # 16 channels after the depthwise spatial conv
T2         = SAMPLES // 4         # 8 time steps after AvgPool2d((1, 4))
F_IN       = N_CHANNELS * SAMPLES # 128 flattened input features per sample
N_OUT_PAD  = 128                  # logits padded to one full lane tile
MXU_DTYPE  = jnp.bfloat16         # operand dtype for ALL matmuls (f32 accumulate)
OUT_DTYPE  = jnp.bfloat16 if MXU_DTYPE == jnp.bfloat16 else jnp.float32

DEFAULT_BATCH_TILE = 512          # per review: 512-1024 amortizes grid-step overhead
SUBLANE_ALIGN      = 16           # bf16 packs 16 sublanes per vreg


# ---------------------------------------------------------------------------
# Pallas kernel: full EEGNet forward for ONE batch tile (grid iterates tiles)
# ---------------------------------------------------------------------------
def eegnet_kernel(x_ref,                       # VMEM (Bt, 128)   bf16 flattened samples
                  m1_ref, b1_ref,              # VMEM (128, 512) bf16, (1, 512) f32
                  m23_ref, b3_ref,             # VMEM (512, 128) bf16, (1, 128) f32
                  mf1_ref, bf1_ref,            # VMEM (128, 128) bf16, (1, 128) f32
                  mf2_ref, bf2_ref,            # VMEM (128, 128) bf16, (1, 128) f32
                  out_ref):                    # VMEM (Bt, 128)   padded logits
    f32 = jnp.float32

    def elu(a):
        # Clamp the exp argument so the unselected branch never produces inf.
        return jnp.where(a > 0, a, jnp.exp(jnp.minimum(a, 0.0)) - 1.0)

    x = x_ref[...]                                                        # (Bt, 128) bf16

    # ---- Block 1: temporal conv + BN1 + depthwise spatial conv + BN2 folded
    #      into M1/b1 on the host.  bf16 operands, f32 accumulate, f32 bias/ELU.
    a1 = jnp.dot(x, m1_ref[...], preferred_element_type=f32) + b1_ref[...]   # (Bt, 512)
    a1 = elu(a1)

    # ---- Block 2 (AvgPool(1,4) folded into M23'): depthwise (1,16) 'same' conv
    #      + pointwise 1x1 conv + BN3, then ELU.
    a3 = jnp.dot(a1.astype(m23_ref.dtype), m23_ref[...],
                 preferred_element_type=f32) + b3_ref[...]                   # (Bt, 128)
    a3 = elu(a3)

    # ---- Classifier: AvgPool2d((1,8)) + Flatten + Linear(16,128) folded into
    #      Mf1/bf1, ReLU, then BatchNorm1d(eval) + Linear(128,10) folded into Mf2/bf2.
    a4 = jnp.dot(a3.astype(mf1_ref.dtype), mf1_ref[...],
                 preferred_element_type=f32) + bf1_ref[...]                  # (Bt, 128)
    a4 = jnp.maximum(a4, 0.0)
    out = jnp.dot(a4.astype(mf2_ref.dtype), mf2_ref[...],
                  preferred_element_type=f32) + bf2_ref[...]                 # (Bt, 128)
    out_ref[...] = out.astype(out_ref.dtype)
    # TODO(synk): Dropout layers are identity (inference semantics); the
    # return_features / feature_extractor branch of the module is not implemented
    # (default classifier path only).


# ---------------------------------------------------------------------------
# Host-side weight folding: exact structured matrices for every conv/pool stage
# ---------------------------------------------------------------------------
def prepare_weights(p, mxu_dtype=MXU_DTYPE):
    """Fold all convs / pools / eval-mode BatchNorms of EEGNet into exact
    structured matrices (float64 numpy, weight-only algebra)."""
    g = lambda name: np.asarray(p[name], np.float64)
    w1, s1, b1 = g('w1'), g('bn1s'), g('bn1b')        # (F1,K1), (F1,), (F1,)
    w2, s2, b2 = g('w2'), g('bn2s'), g('bn2b')        # (F12,C), (F12,), (F12,)
    w3, w4     = g('w3'), g('w4')                     # (F12,K3), (F2,F12)
    s3, b3     = g('bn3s'), g('bn3b')                 # (F2,)
    fc1w, fc1b = g('fc1w'), g('fc1b')                 # (H,F2), (H,)
    sf, bf     = g('bnfs'), g('bnfb')                 # (H,)
    fc2w, fc2b = g('fc2w'), g('fc2b')                 # (NC,H), (NC,)

    T, C = SAMPLES, N_CHANNELS
    lpad1 = (K1 - 1) // 2        # PyTorch 'same' for even kernel: pad (3, 4)
    lpad3 = (K3 - 1) // 2        # pad (7, 8)

    # M1: x[c*T+s] -> h1[o*T+t]  (conv1 + BN1 + depthwise spatial conv + BN2)
    M1 = np.zeros((C * T, F12 * T))
    for o in range(F12):
        f = o // D
        for c in range(C):
            for t in range(T):
                for k in range(K1):
                    s = t + k - lpad1
                    if 0 <= s < T:
                        M1[c * T + s, o * T + t] += w2[o, c] * s1[f] * w1[f, k]
    M1 *= np.repeat(s2, T)[None, :]                                  # fold BN2 scale
    b1row = np.repeat(s2 * b1[np.arange(F12) // D] * w2.sum(1) + b2, T)

    # P1: AvgPool2d((1, 4)) on (F12, T) -> (F12, T2)
    P1 = np.zeros((F12 * T, F12 * T2))
    for o in range(F12):
        for t in range(T):
            P1[o * T + t, o * T2 + t // 4] = 0.25

    # M23: depthwise (1,16) 'same' conv + pointwise 1x1 conv + BN3 scale
    M23 = np.zeros((F12 * T2, F2 * T2))
    for q in range(F2):
        for o in range(F12):
            for t in range(T2):
                for k in range(K3):
                    s = t + k - lpad3
                    if 0 <= s < T2:
                        M23[o * T2 + s, q * T2 + t] += s3[q] * w4[q, o] * w3[o, k]
    b3row = np.repeat(b3, T2)

    # Fold the pool into the next stage: exact, and removes one MXU pass per tile.
    M23p = P1 @ M23                                                   # (F12*T, F2*T2)

    # Mf1: AvgPool2d((1, 8)) + Flatten + Linear(F2, HIDDEN)
    Mf1 = np.zeros((F2 * T2, HIDDEN))
    for q in range(F2):
        for t in range(T2):
            Mf1[q * T2 + t, :] = fc1w[:, q] / T2
    bf1row = fc1b

    # Mf2: BatchNorm1d(eval) + Linear(HIDDEN, N_CLASSES), zero-padded to 128 lanes
    Mf2 = np.zeros((HIDDEN, N_OUT_PAD))
    Mf2[:, :N_CLASSES] = sf[:, None] * fc2w.T
    bf2row = np.zeros((N_OUT_PAD,))
    bf2row[:N_CLASSES] = fc2b + fc2w @ bf

    to_mxu = lambda a: jnp.asarray(a, mxu_dtype)         # matmul operands (bf16 by default)
    row = lambda a: jnp.asarray(a, jnp.float32).reshape(1, -1)   # biases stay f32
    return (to_mxu(M1), row(b1row),
            to_mxu(M23p), row(b3row),
            to_mxu(Mf1), row(bf1row),
            to_mxu(Mf2), row(bf2row))


# ---------------------------------------------------------------------------
# Host-side wrapper: batch tiling, padding, BlockSpecs
# ---------------------------------------------------------------------------
def _round_up(n, m):
    return ((n + m - 1) // m) * m


def _cdiv(a, b):
    return -(-a // b)


def _choose_tiles(B, batch_tile):
    """Pick (batch_tile, n_tiles) so tiles are sublane-aligned, the last tile is
    not mostly padding, and (when the batch allows it) the grid has an even
    number of >=2 steps so both v7x TensorCores get work."""
    if batch_tile is None:
        batch_tile = DEFAULT_BATCH_TILE
    n_tiles = max(_cdiv(B, batch_tile), 2 if B >= 2 * SUBLANE_ALIGN else 1)
    bt = _round_up(_cdiv(B, n_tiles), SUBLANE_ALIGN)
    n_tiles = _cdiv(B, bt)
    if n_tiles > 1 and n_tiles % 2 == 1:
        n_tiles += 1                       # even step count -> balanced across 2 TCs
    return bt, n_tiles


def _const_weight_spec(shape):
    # Constant-index weight blocks are fetched once and stay resident across the
    # grid; request a single pipeline buffer to drop the redundant second buffer.
    if hasattr(pl, "Buffered"):
        try:
            return pl.BlockSpec(shape, lambda b: (0, 0), pipeline_mode=pl.Buffered(1))
        except TypeError:
            pass
    return pl.BlockSpec(shape, lambda b: (0, 0))


def eegnet_forward(x, weights, *, batch_tile=None):
    """x: (B, 1, C, T) NCHW or (B, C, T); weights: output of prepare_weights."""
    if x.ndim == 4:                      # accept NCHW (B, 1, C, T) like the module
        x = x[:, 0]
    B, C, T = x.shape
    assert C == N_CHANNELS and T == SAMPLES

    bt, n_tiles = _choose_tiles(B, batch_tile)
    b_pad = bt * n_tiles

    # Lane-dense (B, C*T) rows, one per sample, streamed as the MXU operand dtype
    # (bf16 by default -> halves input HBM bytes; identical values reach the MXU).
    xf = x.reshape(B, F_IN).astype(MXU_DTYPE)
    if b_pad != B:
        xf = jnp.pad(xf, ((0, b_pad - B), (0, 0)))

    in_specs = [pl.BlockSpec((bt, F_IN), lambda b: (b, 0))]
    in_specs += [_const_weight_spec(w.shape) for w in weights]

    cp_kwargs = dict(dimension_semantics=("parallel",))   # batch tiles are independent
    if bt >= 2048:
        # v5e's scoped-VMEM default is 16 MiB; the (bt, 512) f32 intermediate
        # plus double-buffered I/O needs head-room at very large tiles.
        cp_kwargs["vmem_limit_bytes"] = 64 * 1024 * 1024

    out = pl.pallas_call(
        eegnet_kernel,
        out_shape=jax.ShapeDtypeStruct((b_pad, N_OUT_PAD), OUT_DTYPE),
        grid=(n_tiles,),
        in_specs=in_specs,
        out_specs=pl.BlockSpec((bt, N_OUT_PAD), lambda b: (b, 0)),
        compiler_params=pltpu.CompilerParams(**cp_kwargs),
    )(xf, *weights)
    return out[:B, :N_CLASSES].astype(jnp.float32)


# ---------------------------------------------------------------------------
# Deterministic parameter initialization (shapes from EEGNet.__init__ defaults)
# ---------------------------------------------------------------------------
def init_params(key):
    ks = list(jax.random.split(key, 12))

    def w(k, shape, scale=0.3):
        return (scale * jax.random.normal(k, shape)).astype(jnp.float32)

    def bn(k, n):  # eval-mode BatchNorm folded to (scale, bias)
        k1, k2, k3, k4 = jax.random.split(k, 4)
        gamma = 1.0 + 0.1 * jax.random.normal(k1, (n,))
        beta = 0.1 * jax.random.normal(k2, (n,))
        mean = 0.1 * jax.random.normal(k3, (n,))
        var = jnp.abs(jax.random.normal(k4, (n,))) + 0.5
        s = gamma / jnp.sqrt(var + BN_EPS)
        return s.astype(jnp.float32), (beta - mean * s).astype(jnp.float32)

    p = {}
    p['w1'] = w(ks[0], (F1, K1))              # Conv2d(1, F1, (1, K1)) weight (F1,1,1,K1)
    p['bn1s'], p['bn1b'] = bn(ks[1], F1)
    p['w2'] = w(ks[2], (F12, N_CHANNELS))     # Conv2d(F1, F1*D, (C,1), groups=F1) (F1*D,1,C,1)
    p['bn2s'], p['bn2b'] = bn(ks[3], F12)
    p['w3'] = w(ks[4], (F12, K3))             # Conv2d(16,16,(1,16),groups=16)  (16,1,1,16)
    p['w4'] = w(ks[5], (F2, F12))             # Conv2d(16, F2, 1)               (F2,16,1,1)
    p['bn3s'], p['bn3b'] = bn(ks[6], F2)
    p['fc1w'] = w(ks[7], (HIDDEN, F2), 0.2)   # Linear(feature_size=16, 128)
    p['fc1b'] = w(ks[8], (HIDDEN,), 0.1)
    p['bnfs'], p['bnfb'] = bn(ks[9], HIDDEN)  # BatchNorm1d(128)
    p['fc2w'] = w(ks[10], (N_CLASSES, HIDDEN), 0.2)
    p['fc2b'] = w(ks[11], (N_CLASSES,), 0.1)
    return p


# ---------------------------------------------------------------------------
# Independent numpy reference (float64) mirroring the PyTorch forward (eval)
# ---------------------------------------------------------------------------
def reference_forward(x, P):
    g = lambda name: np.asarray(P[name], np.float64)
    x = np.asarray(x, np.float64)
    B, C, T = x.shape
    # block1: temporal conv, 'same' (pad 3,4 for K1=8)
    xp = np.pad(x, ((0, 0), (0, 0), ((K1 - 1) // 2, (K1 - 1) - (K1 - 1) // 2)))
    w1 = g('w1')
    h = np.zeros((B, F1, C, T))
    for f in range(F1):
        for k in range(K1):
            h[:, f] += xp[:, :, k:k + T] * w1[f, k]
    h = h * g('bn1s')[None, :, None, None] + g('bn1b')[None, :, None, None]
    # depthwise spatial conv (groups=F1)
    w2 = g('w2')
    h2 = np.zeros((B, F12, T))
    for o in range(F12):
        for c in range(C):
            h2[:, o] += h[:, o // D, c, :] * w2[o, c]
    h2 = h2 * g('bn2s')[None, :, None] + g('bn2b')[None, :, None]
    h2 = np.where(h2 > 0, h2, np.exp(h2) - 1.0)
    t2 = T // 4
    h2 = h2.reshape(B, F12, t2, 4).mean(-1)
    # block2: depthwise temporal conv, 'same' (pad 7,8), then pointwise 1x1
    hp = np.pad(h2, ((0, 0), (0, 0), ((K3 - 1) // 2, (K3 - 1) - (K3 - 1) // 2)))
    w3 = g('w3')
    h3 = np.zeros((B, F12, t2))
    for k in range(K3):
        h3 += hp[:, :, k:k + t2] * w3[None, :, k:k + 1]
    h4 = np.einsum('oi,bit->bot', g('w4'), h3)
    h4 = h4 * g('bn3s')[None, :, None] + g('bn3b')[None, :, None]
    h4 = np.where(h4 > 0, h4, np.exp(h4) - 1.0)
    feat = h4.mean(-1)                        # AvgPool(1,8) + Flatten -> (B, 16)
    y = feat @ g('fc1w').T + g('fc1b')
    y = np.maximum(y, 0.0)
    y = y * g('bnfs') + g('bnfb')
    return y @ g('fc2w').T + g('fc2b')


if __name__ == "__main__":
    key = jax.random.PRNGKey(0)
    kx, kp = jax.random.split(key)
    x = jax.random.normal(kx, (4, 1, N_CHANNELS, SAMPLES), dtype=jnp.float32)
    params = init_params(kp)
    weights = prepare_weights(params)

    logits = jax.block_until_ready(eegnet_forward(x, weights))

    ref = reference_forward(np.asarray(x)[:, 0], params)
    assert logits.shape == (4, N_CLASSES)
    err = float(np.max(np.abs(np.asarray(logits, np.float64) - ref)))
    # With bf16 operands on all four matmuls (and bf16 I/O streams) the error is
    # dominated by bf16 rounding; use a tolerance scaled by the logit magnitude.
    ref_scale = max(1.0, float(np.max(np.abs(ref))))
    tol = (5e-2 * ref_scale) if MXU_DTYPE == jnp.bfloat16 else 2e-3
    assert np.isfinite(err) and err < tol, f"mismatch vs reference: {err} (tol {tol})"
    print("KERNEL_OK")
</pallas_src>

<mosaic_0001>
module attributes {stable_mosaic.version = 11 : i64} {
  func.func @eegnet_kernel(%arg0: i32, %arg1: memref<16x128xbf16, #tpu.memory_space<vmem>>, %arg2: memref<128x512xbf16, #tpu.memory_space<vmem>>, %arg3: memref<1x512xf32, #tpu.memory_space<vmem>>, %arg4: memref<512x128xbf16, #tpu.memory_space<vmem>>, %arg5: memref<1x128xf32, #tpu.memory_space<vmem>>, %arg6: memref<128x128xbf16, #tpu.memory_space<vmem>>, %arg7: memref<1x128xf32, #tpu.memory_space<vmem>>, %arg8: memref<128x128xbf16, #tpu.memory_space<vmem>>, %arg9: memref<1x128xf32, #tpu.memory_space<vmem>>, %arg10: memref<16x128xbf16, #tpu.memory_space<vmem>>) attributes {dimension_semantics = [#tpu.dimension_semantics<parallel>], iteration_bounds = array<i64: 1>, scalar_prefetch = 0 : i64, scratch_operands = 0 : i64, tpu.core_type = #tpu.core_type<tc>, window_params = [{transform_indices = @transform_0, window_bounds = array<i64: 16, 128>}, {pipeline_mode = #tpu.pipeline_mode<synchronous>, transform_indices = @transform_1, window_bounds = array<i64: 128, 512>}, {pipeline_mode = #tpu.pipeline_mode<synchronous>, transform_indices = @transform_2, window_bounds = array<i64: 1, 512>}, {pipeline_mode = #tpu.pipeline_mode<synchronous>, transform_indices = @transform_3, window_bounds = array<i64: 512, 128>}, {pipeline_mode = #tpu.pipeline_mode<synchronous>, transform_indices = @transform_4, window_bounds = array<i64: 1, 128>}, {pipeline_mode = #tpu.pipeline_mode<synchronous>, transform_indices = @transform_5, window_bounds = array<i64: 128, 128>}, {pipeline_mode = #tpu.pipeline_mode<synchronous>, transform_indices = @transform_6, window_bounds = array<i64: 1, 128>}, {pipeline_mode = #tpu.pipeline_mode<synchronous>, transform_indices = @transform_7, window_bounds = array<i64: 128, 128>}, {pipeline_mode = #tpu.pipeline_mode<synchronous>, transform_indices = @transform_8, window_bounds = array<i64: 1, 128>}, {transform_indices = @transform_9, window_bounds = array<i64: 16, 128>}]} {
    %c0 = arith.constant 0 : index
    %c0_0 = arith.constant 0 : index
    %0 = vector.load %arg1[%c0, %c0_0] : memref<16x128xbf16, #tpu.memory_space<vmem>>, vector<16x128xbf16>
    %c0_1 = arith.constant 0 : index
    %c0_2 = arith.constant 0 : index
    %1 = vector.load %arg2[%c0_1, %c0_2] : memref<128x512xbf16, #tpu.memory_space<vmem>>, vector<128x512xbf16>
    %cst = arith.constant dense<0.000000e+00> : vector<16x512xf32>
    %2 = tpu.matmul %0, %1, %cst {dimension_numbers = #tpu.dot_dimension_numbers<[1], [0], [0], [1], [0, 0, 1, 1], [], []>} : vector<16x128xbf16>, vector<128x512xbf16>, vector<16x512xf32> -> vector<16x512xf32>
    %c0_3 = arith.constant 0 : index
    %c0_4 = arith.constant 0 : index
    %3 = vector.load %arg3[%c0_3, %c0_4] : memref<1x512xf32, #tpu.memory_space<vmem>>, vector<1x512xf32>
    %4 = vector.broadcast %3 : vector<1x512xf32> to vector<16x512xf32>
    %5 = arith.addf %2, %4 : vector<16x512xf32>
    %cst_5 = arith.constant 0.000000e+00 : f32
    %6 = vector.broadcast %cst_5 : f32 to vector<16x512xf32>
    %7 = arith.cmpf ogt, %5, %6 : vector<16x512xf32>
    %cst_6 = arith.constant 0.000000e+00 : f32
    %8 = vector.broadcast %cst_6 : f32 to vector<16x512xf32>
    %9 = arith.minimumf %5, %8 : vector<16x512xf32>
    %10 = math.exp %9 : vector<16x512xf32>
    %cst_7 = arith.constant 1.000000e+00 : f32
    %11 = vector.broadcast %cst_7 : f32 to vector<16x512xf32>
    %12 = arith.subf %10, %11 : vector<16x512xf32>
    %13 = arith.select %7, %5, %12 : vector<16x512xi1>, vector<16x512xf32>
    %14 = arith.truncf %13 : vector<16x512xf32> to vector<16x512xbf16>
    %c0_8 = arith.constant 0 : index
    %c0_9 = arith.constant 0 : index
    %15 = vector.load %arg4[%c0_8, %c0_9] : memref<512x128xbf16, #tpu.memory_space<vmem>>, vector<512x128xbf16>
    %cst_10 = arith.constant dense<0.000000e+00> : vector<16x128xf32>
    %16 = tpu.matmul %14, %15, %cst_10 {dimension_numbers = #tpu.dot_dimension_numbers<[1], [0], [0], [1], [0, 0, 1, 1], [], []>} : vector<16x512xbf16>, vector<512x128xbf16>, vector<16x128xf32> -> vector<16x128xf32>
    %c0_11 = arith.constant 0 : index
    %c0_12 = arith.constant 0 : index
    %17 = vector.load %arg5[%c0_11, %c0_12] : memref<1x128xf32, #tpu.memory_space<vmem>>, vector<1x128xf32>
    %18 = vector.broadcast %17 : vector<1x128xf32> to vector<16x128xf32>
    %19 = arith.addf %16, %18 : vector<16x128xf32>
    %cst_13 = arith.constant 0.000000e+00 : f32
    %20 = vector.broadcast %cst_13 : f32 to vector<16x128xf32>
    %21 = arith.cmpf ogt, %19, %20 : vector<16x128xf32>
    %cst_14 = arith.constant 0.000000e+00 : f32
    %22 = vector.broadcast %cst_14 : f32 to vector<16x128xf32>
    %23 = arith.minimumf %19, %22 : vector<16x128xf32>
    %24 = math.exp %23 : vector<16x128xf32>
    %cst_15 = arith.constant 1.000000e+00 : f32
    %25 = vector.broadcast %cst_15 : f32 to vector<16x128xf32>
    %26 = arith.subf %24, %25 : vector<16x128xf32>
    %27 = arith.select %21, %19, %26 : vector<16x128xi1>, vector<16x128xf32>
    %28 = arith.truncf %27 : vector<16x128xf32> to vector<16x128xbf16>
    %c0_16 = arith.constant 0 : index
    %c0_17 = arith.constant 0 : index
    %29 = vector.load %arg6[%c0_16, %c0_17] : memref<128x128xbf16, #tpu.memory_space<vmem>>, vector<128x128xbf16>
    %cst_18 = arith.constant dense<0.000000e+00> : vector<16x128xf32>
    %30 = tpu.matmul %28, %29, %cst_18 {dimension_numbers = #tpu.dot_dimension_numbers<[1], [0], [0], [1], [0, 0, 1, 1], [], []>} : vector<16x128xbf16>, vector<128x128xbf16>, vector<16x128xf32> -> vector<16x128xf32>
    %c0_19 = arith.constant 0 : index
    %c0_20 = arith.constant 0 : index
    %31 = vector.load %arg7[%c0_19, %c0_20] : memref<1x128xf32, #tpu.memory_space<vmem>>, vector<1x128xf32>
    %32 = vector.broadcast %31 : vector<1x128xf32> to vector<16x128xf32>
    %33 = arith.addf %30, %32 : vector<16x128xf32>
    %cst_21 = arith.constant 0.000000e+00 : f32
    %34 = vector.broadcast %cst_21 : f32 to vector<16x128xf32>
    %35 = arith.maximumf %33, %34 : vector<16x128xf32>
    %36 = arith.truncf %35 : vector<16x128xf32> to vector<16x128xbf16>
    %c0_22 = arith.constant 0 : index
    %c0_23 = arith.constant 0 : index
    %37 = vector.load %arg8[%c0_22, %c0_23] : memref<128x128xbf16, #tpu.memory_space<vmem>>, vector<128x128xbf16>
    %cst_24 = arith.constant dense<0.000000e+00> : vector<16x128xf32>
    %38 = tpu.matmul %36, %37, %cst_24 {dimension_numbers = #tpu.dot_dimension_numbers<[1], [0], [0], [1], [0, 0, 1, 1], [], []>} : vector<16x128xbf16>, vector<128x128xbf16>, vector<16x128xf32> -> vector<16x128xf32>
    %c0_25 = arith.constant 0 : index
    %c0_26 = arith.constant 0 : index
    %39 = vector.load %arg9[%c0_25, %c0_26] : memref<1x128xf32, #tpu.memory_space<vmem>>, vector<1x128xf32>
    %40 = vector.broadcast %39 : vector<1x128xf32> to vector<16x128xf32>
    %41 = arith.addf %38, %40 : vector<16x128xf32>
    %42 = arith.truncf %41 : vector<16x128xf32> to vector<16x128xbf16>
    %c0_27 = arith.constant 0 : index
    %c0_28 = arith.constant 0 : index
    %43 = vector.load %arg10[%c0_27, %c0_28] : memref<16x128xbf16, #tpu.memory_space<vmem>>, vector<16x128xbf16>
    tpu.vector_store %arg10[%c0_27, %c0_28], %42 {strides = array<i32>} : memref<16x128xbf16, #tpu.memory_space<vmem>>, vector<16x128xbf16>,
    return
  }
  func.func @transform_0(%arg0: i32) -> (i32, i32) {
    %c0_i32 = arith.constant 0 : i32
    %c0_i32_0 = arith.constant 0 : i32
    return %arg0, %c0_i32 : i32, i32
  }
  func.func @transform_1(%arg0: i32) -> (i32, i32) {
    %c0_i32 = arith.constant 0 : i32
    %c0_i32_0 = arith.constant 0 : i32
    %c0_i32_1 = arith.constant 0 : i32
    return %c0_i32, %c0_i32_0 : i32, i32
  }
  func.func @transform_2(%arg0: i32) -> (i32, i32) {
    %c0_i32 = arith.constant 0 : i32
    %c0_i32_0 = arith.constant 0 : i32
    %c0_i32_1 = arith.constant 0 : i32
    return %c0_i32, %c0_i32_0 : i32, i32
  }
  func.func @transform_3(%arg0: i32) -> (i32, i32) {
    %c0_i32 = arith.constant 0 : i32
    %c0_i32_0 = arith.constant 0 : i32
    %c0_i32_1 = arith.constant 0 : i32
    return %c0_i32, %c0_i32_0 : i32, i32
  }
  func.func @transform_4(%arg0: i32) -> (i32, i32) {
    %c0_i32 = arith.constant 0 : i32
    %c0_i32_0 = arith.constant 0 : i32
    %c0_i32_1 = arith.constant 0 : i32
    return %c0_i32, %c0_i32_0 : i32, i32
  }
  func.func @transform_5(%arg0: i32) -> (i32, i32) {
    %c0_i32 = arith.constant 0 : i32
    %c0_i32_0 = arith.constant 0 : i32
    %c0_i32_1 = arith.constant 0 : i32
    return %c0_i32, %c0_i32_0 : i32, i32
  }
  func.func @transform_6(%arg0: i32) -> (i32, i32) {
    %c0_i32 = arith.constant 0 : i32
    %c0_i32_0 = arith.constant 0 : i32
    %c0_i32_1 = arith.constant 0 : i32
    return %c0_i32, %c0_i32_0 : i32, i32
  }
  func.func @transform_7(%arg0: i32) -> (i32, i32) {
    %c0_i32 = arith.constant 0 : i32
    %c0_i32_0 = arith.constant 0 : i32
    %c0_i32_1 = arith.constant 0 : i32
    return %c0_i32, %c0_i32_0 : i32, i32
  }
  func.func @transform_8(%arg0: i32) -> (i32, i32) {
    %c0_i32 = arith.constant 0 : i32
    %c0_i32_0 = arith.constant 0 : i32
    %c0_i32_1 = arith.constant 0 : i32
    return %c0_i32, %c0_i32_0 : i32, i32
  }
  func.func @transform_9(%arg0: i32) -> (i32, i32) {
    %c0_i32 = arith.constant 0 : i32
    %c0_i32_0 = arith.constant 0 : i32
    return %arg0, %c0_i32 : i32, i32
  }
}

</mosaic_0001>

<bundles_post_ra>
// kernel: tpu_custom_call.1
= control target key start
LH: loop header
LB: loop body
LE: loop exit
PB: predicated region body
PF: predicated region fallthrough
CT: control target
= control target key end

     0   :  { %14 = vsyncpa [#allocation3], 0  ;;  %s1713_s0 = inlined_call_operand.hbm [shape: bf16[16,128], index: 0, kind: input, shape index: {}]   ;;  %s1714_s1 = inlined_call_operand.hbm [shape: bf16[128,512], index: 1, kind: input, shape index: {}]   ;;  %s1715_s2 = inlined_call_operand.hbm [shape: f32[1,512], index: 2, kind: input, shape index: {}]   ;;  %s1716_s3 = inlined_call_operand.hbm [shape: bf16[512,128], index: 3, kind: input, shape index: {}]   ;;  %s1717_s4 = inlined_call_operand.vmem [shape: f32[1,128], index: 4, kind: input, shape index: {}]   ;;  %s1718_s5 = inlined_call_operand.hbm [shape: bf16[128,128], index: 5, kind: input, shape index: {}]   ;;  %s1719_s6 = inlined_call_operand.vmem [shape: f32[1,128], index: 6, kind: input, shape index: {}]   ;;  %s1720_s7 = inlined_call_operand.hbm [shape: bf16[128,128], index: 7, kind: input, shape index: {}]   ;;  %s1721_s8 = inlined_call_operand.vmem [shape: f32[1,128], index: 8, kind: input, shape index: {}]   ;;  %s1722_s9 = inlined_call_operand.hbm [shape: bf16[16,128], index: 9, kind: output, shape index: {}]  }
   0x1   :  { %15 = vsyncpa [#allocation6], 0 }
   0x2   :  { %16 = vsyncpa [#allocation9], 0 }
   0x3   :  { %17 = vsyncpa [#allocation12], 0  ;;  %s36_s11 = sshll.u32 %s1714_s1, 4  ;;  %s37_s11 = int_to_ptr.hbm [resolvable:$true] %s36_s11 }
   0x4   :  { %18 = vsyncpa [#allocation4], 0  ;;  %s1597_s12 = smov [#allocation5]   ;;  %s1598_s14 = smov 256  }
   0x5   :  { %s38_s13 = sshll.u32 %s1597_s12, 4  ;;  %s1599_s15 = smov 16   ;;  %s39_s13 = int_to_ptr.vmem [resolvable:$true] %s38_s13 }
   0x6   :  { %44 = dma.hbm_to_vmem [thread:$0]  %s37_s11, 4096, %s39_s13, [#allocation6], %s1598_s14, %s1598_s14, %s1599_s15  }
   0x7   :  { %s60_s18 = sshll.u32 %s1716_s3, 4  ;;  %s1600_s19 = smov [#allocation8]   ;;  %s61_s18 = int_to_ptr.hbm [resolvable:$true] %s60_s18 }
   0x8   :  { %s62_s20 = sshll.u32 %s1600_s19, 4  ;;  %s23_s23 = sshll.u32 %s1713_s0, 4  ;;  %s63_s20 = int_to_ptr.vmem [resolvable:$true] %s62_s20  ;;  %s24_s23 = int_to_ptr.hbm [resolvable:$true] %s23_s23 }
   0x9   :  { %s1601_s1 = smov 64   ;;  %s1602_s24 = smov 4  }
   0xa   :  { %68 = dma.hbm_to_vmem [thread:$0]  %s61_s18, 4096, %s63_s20, [#allocation9], %s1601_s1, %s1601_s1, %s1602_s24  }
   0xb   :  { %s50_s27 = sshll.u32 %s1715_s2, 4  ;;  %s1603_s3 = smov [#allocation2]   ;;  %s51_s27 = int_to_ptr.hbm [resolvable:$true] %s50_s27 }
   0xc   :  { %s25_s28 = sshll.u32 %s1603_s3, 4  ;;  %s1604_s0 = smov [#allocation7]   ;;  %s26_s28 = int_to_ptr.vmem [resolvable:$true] %s25_s28 }
   0xd   :  { %31 = dma.hbm_to_vmem [thread:$0]  %s24_s23, 128, %s26_s28, [#allocation3], %s1601_s1, %s1601_s1, %s1602_s24  }
   0xe   :  { %s52_s29 = sshll.u32 %s1604_s0, 4  ;;  %s75_s11 = sshll.u32 %s1718_s5, 4  ;;  %s53_s29 = int_to_ptr.vmem [resolvable:$true] %s52_s29  ;;  %s76_s11 = int_to_ptr.hbm [resolvable:$true] %s75_s11 }
   0xf   :  { %55 = dma.hbm_to_vmem [thread:$0]  %s51_s27, 64, %s53_s29, [#allocation6]  }
  0x10   :  { %s90_s2 = sshll.u32 %s1720_s7, 4  ;;  %s1605_s14 = smov [#allocation10]   ;;  %s91_s2 = int_to_ptr.hbm [resolvable:$true] %s90_s2 }
  0x11   :  { %s77_s15 = sshll.u32 %s1605_s14, 4  ;;  %s1606_s16 = smov [#allocation11]   ;;  %s78_s15 = int_to_ptr.vmem [resolvable:$true] %s77_s15 }
  0x12   :  { %83 = dma.hbm_to_vmem [thread:$0]  %s76_s11, 1024, %s78_s15, [#allocation9], %s1601_s1, %s1601_s1, %s1602_s24  }
  0x13   :  { %s92_s17 = sshll.u32 %s1606_s16, 4  ;;  %s93_s17 = int_to_ptr.vmem [resolvable:$true] %s92_s17 }
  0x14   :  { %98 = dma.hbm_to_vmem [thread:$0]  %s91_s2, 1024, %s93_s17, [#allocation12], %s1601_s1, %s1601_s1, %s1602_s24  }
  0x15   :  { %1587 = dma.done.wait [#allocation3], 128  }
  0x16   :  { %1588 = vsyncadd [#allocation3], 4294967168 }
  0x17   :  { %1589 = dma.done.wait [#allocation6], 4160  }
  0x18   :  { %1590 = vsyncadd [#allocation6], 4294963136 }
  0x19   :  { %1591 = dma.done.wait [#allocation9], 5120  }
  0x1a   :  { %1592 = vsyncadd [#allocation9], 4294962176 }
  0x1b   :  { %1593 = dma.done.wait [#allocation12], 1024  }
  0x1c   :  { %1594 = vsyncadd [#allocation12], 4294966272  ;;  %v1083_v0 = vld [vmem:[#allocation5 + $0xe0] sm:$0xf]  ;;  %v1330_v1 = vld [vmem:[#allocation5 + $0xec] sm:$0xf0] }
  0x1d   :  { %v1328_v2 = vld [vmem:[#allocation5 + $0xe4] sm:$0xf]  ;;  %v1084_v3 = vor.u32 %v1330_v1, %v1083_v0  ;;  %v1085_v4 = vld [vmem:[#allocation5 + $0xf0] sm:$0xf0]  ;;  %v1091_v5 = vld [vmem:[#allocation5 + $0xe8] sm:$0xf] }
  0x1e   :  { %v1331_v6 = vld [vmem:[#allocation5 + $0xf4] sm:$0xf0]  ;;  %v1088_v7 = vor.u32 %v1328_v2, %v1085_v4  ;;  %v1329_v9 = vld [vmem:[#allocation5 + $0xec] sm:$0xf]  ;;  %v1093_v10 = vld [vmem:[#allocation5 + $0xf8] sm:$0xf0] }
  0x1f   :  { %v1092_v8 = vor.u32 %v1331_v6, %v1091_v5  ;;  %v1067_v11 = vld [vmem:[#allocation5 + $0xc0] sm:$0xf]  ;;  %335 = vmatpush.bf16.msra.mxu0 %v1084_v3  ;;  %v1096_v12 = vor.u32 %v1329_v9, %v1093_v10  ;;  %v1326_v13 = vld [vmem:[#allocation5 + $0xcc] sm:$0xf0]  ;;  %v1324_v14 = vld [vmem:[#allocation5 + $0xc4] sm:$0xf] }
  0x20   :  { %v1069_v15 = vld [vmem:[#allocation5 + $0xd0] sm:$0xf0]  ;;  %349 = vmatpush.bf16.msra.mxu1 %v1088_v7  ;;  %v1068_v16 = vor.u32 %v1326_v13, %v1067_v11  ;;  %v1075_v18 = vld [vmem:[#allocation5 + $0xc8] sm:$0xf]  ;;  %v1327_v19 = vld [vmem:[#allocation5 + $0xd4] sm:$0xf0] }
  0x21   :  { %363 = vmatpush.bf16.msra.mxu2 %v1092_v8  ;;  %v1072_v17 = vor.u32 %v1324_v14, %v1069_v15  ;;  %v1325_v20 = vld [vmem:[#allocation5 + $0xcc] sm:$0xf]  ;;  %377 = vmatpush.bf16.msra.mxu3 %v1096_v12  ;;  %v1076_v21 = vor.u32 %v1327_v19, %v1075_v18  ;;  %v1077_v22 = vld [vmem:[#allocation5 + $0xd8] sm:$0xf0]  ;;  %v1051_v23 = vld [vmem:[#allocation5 + $0xa0] sm:$0xf] }
  0x22   :  { %v1322_v24 = vld [vmem:[#allocation5 + $0xac] sm:$0xf0]  ;;  %v1080_v25 = vor.u32 %v1325_v20, %v1077_v22  ;;  %v1320_v26 = vld [vmem:[#allocation5 + $0xa4] sm:$0xf]  ;;  %v1053_v27 = vld [vmem:[#allocation5 + $0xb0] sm:$0xf0] }
  0x23   :  { %v1059_v28 = vld [vmem:[#allocation5 + $0xa8] sm:$0xf]  ;;  %336 = vmatpush.bf16.msra.mxu0 %v1068_v16  ;;  %v1052_v29 = vor.u32 %v1322_v24, %v1051_v23  ;;  %v1323_v30 = vld [vmem:[#allocation5 + $0xb4] sm:$0xf0]  ;;  %v1321_v31 = vld [vmem:[#allocation5 + $0xac] sm:$0xf]  ;;  %v1056_v33 = vor.u32 %v1320_v26, %v1053_v27 }
  0x24   :  { %v1061_v32 = vld [vmem:[#allocation5 + $0xb8] sm:$0xf0]  ;;  %350 = vmatpush.bf16.msra.mxu1 %v1072_v17  ;;  %v1060_v34 = vor.u32 %v1323_v30, %v1059_v28  ;;  %v1035_v35 = vld [vmem:[#allocation5 + $0x80] sm:$0xf]  ;;  %v1318_v36 = vld [vmem:[#allocation5 + $0x8c] sm:$0xf0] }
  0x25   :  { %364 = vmatpush.bf16.msra.mxu2 %v1076_v21  ;;  %v1316_v37 = vld [vmem:[#allocation5 + $0x84] sm:$0xf]  ;;  %378 = vmatpush.bf16.msra.mxu3 %v1080_v25  ;;  %v1064_v38 = vor.u32 %v1321_v31, %v1061_v32  ;;  %v1037_v39 = vld [vmem:[#allocation5 + $0x90] sm:$0xf0]  ;;  %v1043_v40 = vld [vmem:[#allocation5 + $0x88] sm:$0xf]  ;;  %v1036_v44 = vor.u32 %v1318_v36, %v1035_v35 }
  0x26   :  { %v1319_v41 = vld [vmem:[#allocation5 + $0x94] sm:$0xf0]  ;;  %v1317_v42 = vld [vmem:[#allocation5 + $0x8c] sm:$0xf]  ;;  %v1045_v43 = vld [vmem:[#allocation5 + $0x98] sm:$0xf0]  ;;  %v1040_v45 = vor.u32 %v1316_v37, %v1037_v39 }
  0x27   :  { %337 = vmatpush.bf16.msra.mxu0 %v1052_v29  ;;  %v1044_v46 = vor.u32 %v1319_v41, %v1043_v40  ;;  %v1019_v47 = vld [vmem:[#allocation5 + $0x60] sm:$0xf]  ;;  %v1314_v48 = vld [vmem:[#allocation5 + $0x6c] sm:$0xf0]  ;;  %v1312_v49 = vld [vmem:[#allocation5 + $0x64] sm:$0xf]  ;;  %v1048_v50 = vor.u32 %v1317_v42, %v1045_v43 }
  0x28   :  { %351 = vmatpush.bf16.msra.mxu1 %v1056_v33  ;;  %v1021_v51 = vld [vmem:[#allocation5 + $0x70] sm:$0xf0]  ;;  %v1027_v52 = vld [vmem:[#allocation5 + $0x68] sm:$0xf]  ;;  %v1315_v53 = vld [vmem:[#allocation5 + $0x74] sm:$0xf0]  ;;  %v1020_v56 = vor.u32 %v1314_v48, %v1019_v47 }
  0x29   :  { %365 = vmatpush.bf16.msra.mxu2 %v1060_v34  ;;  %379 = vmatpush.bf16.msra.mxu3 %v1064_v38  ;;  %v1313_v54 = vld [vmem:[#allocation5 + $0x6c] sm:$0xf]  ;;  %v1029_v55 = vld [vmem:[#allocation5 + $0x78] sm:$0xf0]  ;;  %v1024_v57 = vor.u32 %v1312_v49, %v1021_v51  ;;  %v1028_v58 = vor.u32 %v1315_v53, %v1027_v52  ;;  %v1003_v59 = vld [vmem:[#allocation5 + $0x40] sm:$0xf] }
  0x2a   :  { %v1310_v60 = vld [vmem:[#allocation5 + $0x4c] sm:$0xf0]  ;;  %v1308_v61 = vld [vmem:[#allocation5 + $0x44] sm:$0xf]  ;;  %v1032_v62 = vor.u32 %v1313_v54, %v1029_v55  ;;  %v1005_v63 = vld [vmem:[#allocation5 + $0x50] sm:$0xf0] }
  0x2b   :  { %338 = vmatpush.bf16.msra.mxu0 %v1036_v44  ;;  %v1011_v0 = vld [vmem:[#allocation5 + $0x48] sm:$0xf]  ;;  %v1311_v1 = vld [vmem:[#allocation5 + $0x54] sm:$0xf0]  ;;  %v1309_v2 = vld [vmem:[#allocation5 + $0x4c] sm:$0xf]  ;;  %v1004_v4 = vor.u32 %v1310_v60, %v1003_v59  ;;  %v1008_v5 = vor.u32 %v1308_v61, %v1005_v63 }
  0x2c   :  { %352 = vmatpush.bf16.msra.mxu1 %v1040_v45  ;;  %v1013_v3 = vld [vmem:[#allocation5 + $0x58] sm:$0xf0]  ;;  %v1012_v6 = vor.u32 %v1311_v1, %v1011_v0  ;;  %v987_v7 = vld [vmem:[#allocation5 + $0x20] sm:$0xf]  ;;  %v1306_v8 = vld [vmem:[#allocation5 + $0x2c] sm:$0xf0] }
  0x2d   :  { %366 = vmatpush.bf16.msra.mxu2 %v1044_v46  ;;  %380 = vmatpush.bf16.msra.mxu3 %v1048_v50  ;;  %v1304_v9 = vld [vmem:[#allocation5 + $0x24] sm:$0xf]  ;;  %v1016_v10 = vor.u32 %v1309_v2, %v1013_v3  ;;  %v989_v11 = vld [vmem:[#allocation5 + $0x30] sm:$0xf0]  ;;  %v995_v12 = vld [vmem:[#allocation5 + $0x28] sm:$0xf]  ;;  %v988_v16 = vor.u32 %v1306_v8, %v987_v7 }
  0x2e   :  { %v1307_v13 = vld [vmem:[#allocation5 + $0x34] sm:$0xf0]  ;;  %v1305_v14 = vld [vmem:[#allocation5 + $0x2c] sm:$0xf]  ;;  %v997_v15 = vld [vmem:[#allocation5 + $0x38] sm:$0xf0]  ;;  %v992_v17 = vor.u32 %v1304_v9, %v989_v11 }
  0x2f   :  { %339 = vmatpush.bf16.msra.mxu0 %v1020_v56  ;;  %v996_v18 = vor.u32 %v1307_v13, %v995_v12  ;;  %v971_v19 = vld [vmem:[#allocation5] sm:$0xf]  ;;  %v1302_v20 = vld [vmem:[#allocation5 + $0xc] sm:$0xf0]  ;;  %v1300_v21 = vld [vmem:[#allocation5 + $0x4] sm:$0xf]  ;;  %v1000_v22 = vor.u32 %v1305_v14, %v997_v15 }
  0x30   :  { %353 = vmatpush.bf16.msra.mxu1 %v1024_v57  ;;  %v973_v23 = vld [vmem:[#allocation5 + $0x10] sm:$0xf0]  ;;  %v979_v24 = vld [vmem:[#allocation5 + $0x8] sm:$0xf]  ;;  %v1303_v25 = vld [vmem:[#allocation5 + $0x14] sm:$0xf0]  ;;  %v972_v28 = vor.u32 %v1302_v20, %v971_v19 }
  0x31   :  { %367 = vmatpush.bf16.msra.mxu2 %v1028_v58  ;;  %381 = vmatpush.bf16.msra.mxu3 %v1032_v62  ;;  %v1301_v26 = vld [vmem:[#allocation5 + $0xc] sm:$0xf]  ;;  %v981_v27 = vld [vmem:[#allocation5 + $0x18] sm:$0xf0]  ;;  %v976_v29 = vor.u32 %v1300_v21, %v973_v23  ;;  %v980_v30 = vor.u32 %v1303_v25, %v979_v24  ;;  %v1338_v35 = vld [vmem:[#allocation8 + $0x30] sm:$0xff]  ;;  %s1607_s21 = smov [#allocation13]  }
  0x32   :  { %v984_v31 = vor.u32 %v1301_v26, %v981_v27  ;;  %v1339_v32 = vld [vmem:[#allocation8 + $0x38] sm:$0xff]  ;;  %v1346_v36 = vld [vmem:[#allocation8 + $0x70] sm:$0xff]  ;;  %v1337_v39 = vld [vmem:[#allocation8 + $0x28] sm:$0xff]  ;;  %s947_s22 = sshll.u32 %s1607_s21, 4  ;;  %s949_s26 = sshll.u32 %s1722_s9, 4  ;;  %s948_s22 = int_to_ptr.vmem [resolvable:$true] %s947_s22  ;;  %s950_s26 = int_to_ptr.hbm [resolvable:$true] %s949_s26 }
  0x33   :  { %340 = vmatpush.bf16.msra.mxu0 %v1004_v4  ;;  %v1299_v33 = vld [vmem:[#allocation2] sm:$0xff]  ;;  %v1345_v40 = vld [vmem:[#allocation8 + $0x68] sm:$0xff]  ;;  %v1336_v43 = vld [vmem:[#allocation8 + $0x20] sm:$0xff] }
  0x34   :  { %354 = vmatpush.bf16.msra.mxu1 %v1008_v5  ;;  %v1347_v34 = vld [vmem:[#allocation8 + $0x78] sm:$0xff]  ;;  %v1354_v41 = vld [vmem:[#allocation8 + $0xb0] sm:$0xff]  ;;  %v1344_v44 = vld [vmem:[#allocation8 + $0x60] sm:$0xff] }
  0x35   :  { %368 = vmatpush.bf16.msra.mxu2 %v1012_v6  ;;  %382 = vmatpush.bf16.msra.mxu3 %v1016_v10  ;;  %v1355_v37 = vld [vmem:[#allocation8 + $0xb8] sm:$0xff]  ;;  %v1362_v42 = vld [vmem:[#allocation8 + $0xf0] sm:$0xff]  ;;  %v1353_v45 = vld [vmem:[#allocation8 + $0xa8] sm:$0xff] }
  0x36   :  { %v1363_v38 = vld [vmem:[#allocation8 + $0xf8] sm:$0xff]  ;;  %v1361_v46 = vld [vmem:[#allocation8 + $0xe8] sm:$0xff]  ;;  %v1352_v49 = vld [vmem:[#allocation8 + $0xa0] sm:$0xff] }
  0x37   :  { %341 = vmatpush.bf16.msra.mxu0 %v988_v16  ;;  %v1335_v47 = vld [vmem:[#allocation8 + $0x18] sm:$0xff]  ;;  %v1360_v50 = vld [vmem:[#allocation8 + $0xe0] sm:$0xff]  ;;  %v1334_v51 = vld [vmem:[#allocation8 + $0x10] sm:$0xff] }
  0x38   :  { %355 = vmatpush.bf16.msra.mxu1 %v992_v17  ;;  %v1343_v48 = vld [vmem:[#allocation8 + $0x58] sm:$0xff]  ;;  %v1342_v52 = vld [vmem:[#allocation8 + $0x50] sm:$0xff]  ;;  %v1333_v55 = vld [vmem:[#allocation8 + $0x8] sm:$0xff] }
  0x39   :  { %369 = vmatpush.bf16.msra.mxu2 %v996_v18  ;;  %383 = vmatpush.bf16.msra.mxu3 %v1000_v22  ;;  %v1351_v53 = vld [vmem:[#allocation8 + $0x98] sm:$0xff]  ;;  %v1341_v56 = vld [vmem:[#allocation8 + $0x48] sm:$0xff]  ;;  %v1350_v57 = vld [vmem:[#allocation8 + $0x90] sm:$0xff] }
  0x3a   :  { %v1359_v54 = vld [vmem:[#allocation8 + $0xd8] sm:$0xff]  ;;  %v1358_v58 = vld [vmem:[#allocation8 + $0xd0] sm:$0xff]  ;;  %v1332_v59 = vld [vmem:[#allocation8] sm:$0xff] }
  0x3b   :  { %342 = vmatpush.bf16.msra.mxu0 %v972_v28  ;;  %v1340_v60 = vld [vmem:[#allocation8 + $0x40] sm:$0xff]  ;;  %v159_v61 = vld [vmem:[#allocation7] sm:$0xf]  ;;  %v1349_v62 = vld [vmem:[#allocation8 + $0x88] sm:$0xff] }
  0x3c   :  { %356 = vmatpush.bf16.msra.mxu1 %v976_v29  ;;  %v1357_v63 = vld [vmem:[#allocation8 + $0xc8] sm:$0xff]  ;;  %v161_v0 = vperm.slane %v159_v61, 0  ;;  %v162_v1 = vperm.slane %v159_v61, 1  ;;  %v1348_v2 = vld [vmem:[#allocation8 + $0x80] sm:$0xff]  ;;  %v163_v9 = vperm.slane %v159_v61, 2  ;;  %v164_v11 = vperm.slane %v159_v61, 3 }
  0x3d   :  { %370 = vmatpush.bf16.msra.mxu2 %v980_v30  ;;  %384 = vmatpush.bf16.msra.mxu3 %v984_v31  ;;  %v1356_v3 = vld [vmem:[#allocation8 + $0xc0] sm:$0xff] }
  0x3e   :  { %343 = vmatmul.bf16.vlgmr.msra.gmra.mxu0 %v1299_v33 }
  0x3f   :  { %703 = vmatpush.bf16.msrb.mxu0 %v1339_v32  ;;  %357 = vmatmul.bf16.vlgmr.msra.gmra.mxu1 %v1299_v33 }
  0x40   :  { %717 = vmatpush.bf16.msrb.mxu1 %v1347_v34  ;;  %371 = vmatmul.bf16.vlgmr.msra.gmra.mxu2 %v1299_v33 }
  0x41   :  { %385 = vmatmul.bf16.vlgmr.msra.gmra.mxu3 %v1299_v33  ;;  %731 = vmatpush.bf16.msrb.mxu2 %v1355_v37 }
  0x42   :  { %745 = vmatpush.bf16.msrb.mxu3 %v1363_v38 }
  0x43   :  { %704 = vmatpush.bf16.msrb.mxu0 %v1338_v35 }
  0x44   :  { %718 = vmatpush.bf16.msrb.mxu1 %v1346_v36 }
  0x45   :  { %732 = vmatpush.bf16.msrb.mxu2 %v1354_v41 }
  0x46   :  { %746 = vmatpush.bf16.msrb.mxu3 %v1362_v42 }
  0x47   :  { %705 = vmatpush.bf16.msrb.mxu0 %v1337_v39 }
  0x48   :  { %719 = vmatpush.bf16.msrb.mxu1 %v1345_v40 }
  0x49   :  { %733 = vmatpush.bf16.msrb.mxu2 %v1353_v45 }
  0x4a   :  { %747 = vmatpush.bf16.msrb.mxu3 %v1361_v46 }
  0x4b   :  { %706 = vmatpush.bf16.msrb.mxu0 %v1336_v43 }
  0x4c   :  { %720 = vmatpush.bf16.msrb.mxu1 %v1344_v44 }
  0x4d   :  { %734 = vmatpush.bf16.msrb.mxu2 %v1352_v49 }
  0x4e   :  { %748 = vmatpush.bf16.msrb.mxu3 %v1360_v50 }
  0x4f   :  { %707 = vmatpush.bf16.msrb.mxu0 %v1335_v47 }
  0x50   :  { %721 = vmatpush.bf16.msrb.mxu1 %v1343_v48 }
  0x51   :  { %735 = vmatpush.bf16.msrb.mxu2 %v1351_v53 }
  0x52   :  { %749 = vmatpush.bf16.msrb.mxu3 %v1359_v54 }
  0x53   :  { %708 = vmatpush.bf16.msrb.mxu0 %v1334_v51 }
  0x54   :  { %722 = vmatpush.bf16.msrb.mxu1 %v1342_v52 }
  0x55   :  { %736 = vmatpush.bf16.msrb.mxu2 %v1350_v57 }
  0x56   :  { %750 = vmatpush.bf16.msrb.mxu3 %v1358_v58 }
  0x57   :  { %709 = vmatpush.bf16.msrb.mxu0 %v1333_v55 }
  0x58   :  { %723 = vmatpush.bf16.msrb.mxu1 %v1341_v56 }
  0x59   :  { %737 = vmatpush.bf16.msrb.mxu2 %v1349_v62 }
  0x5a   :  { %751 = vmatpush.bf16.msrb.mxu3 %v1357_v63 }
  0x5b   :  { %710 = vmatpush.bf16.msrb.mxu0 %v1332_v59 }
  0x5c   :  { %724 = vmatpush.bf16.msrb.mxu1 %v1340_v60 }
  0x5d   :  { %738 = vmatpush.bf16.msrb.mxu2 %v1348_v2  ;;  %v1371_v2 = vld [vmem:[#allocation10 + $0x38] sm:$0xff] }
  0x5e   :  { %752 = vmatpush.bf16.msrb.mxu3 %v1356_v3  ;;  %v1370_v3 = vld [vmem:[#allocation10 + $0x30] sm:$0xff] }
  0x5f   :  { %840 = vmatpush.bf16.msra.mxu0 %v1371_v2 }
  0x63   :  { %841 = vmatpush.bf16.msra.mxu0 %v1370_v3 }
  0xbb   :  { %v344_v4 = vpop.f32.mrf.mxu0 }
  0xbc   :  { %v345_v5 = vadd.f32 %v344_v4, %v161_v0  ;;  %v358_v6 = vpop.f32.mrf.mxu1  ;;  %v1369_v4 = vld [vmem:[#allocation10 + $0x28] sm:$0xff] }
  0xbd   :  { %v359_v7 = vadd.f32 %v358_v6, %v162_v1  ;;  %842 = vmatpush.bf16.msra.mxu0 %v1369_v4  ;;  %v1367_v6 = vld [vmem:[#allocation10 + $0x18] sm:$0xff] }
  0xbe   :  { %v399_v8 = vmin.f32 %v345_v5, 0.0  ;;  %vm391_vm0 = vcmp.gt.f32.partialorder %v345_v5, 0.0 }
  0xbf   :  { %v400_v10 = vmin.f32 %v359_v7, 0.0  ;;  %vm392_vm2 = vcmp.gt.f32.partialorder %v359_v7, 0.0 }
  0xc0   :  { %v407_v13 = vmul.f32 1.442695, %v399_v8  ;;  %v1365_v8 = vld [vmem:[#allocation10 + $0x8] sm:$0xff] }
  0xc1   :  { %v409_v17 = vmul.f32 1.442695, %v400_v10  ;;  %v1396_v10 = vld [vmem:[%s1717_s4] ss:$0 sm:$0xff] }
  0xc2   :  { %1399 = vpow2.f32 %v407_v13 }
  0xc3   :  { %v372_v12 = vpop.f32.mrf.mxu2  ;;  %v346_v16 = vpop.f32.mrf.mxu0  ;;  %1401 = vpow2.f32 %v409_v17 }
  0xc4   :  { %v1688_v14 = vadd.f32 %v372_v12, %v163_v9  ;;  %v386_v15 = vpop.f32.mrf.mxu3  ;;  %v347_v19 = vadd.f32 %v346_v16, %v161_v0  ;;  %v360_v20 = vpop.f32.mrf.mxu1  ;;  %v1378_v16 = vld [vmem:[#allocation11 + $0x30] sm:$0xff] }
  0xc5   :  { %v1690_v18 = vadd.f32 %v386_v15, %v164_v11  ;;  %v361_v22 = vadd.f32 %v360_v20, %v162_v1 }
  0xc6   :  { %v401_v21 = vmin.f32 %v1688_v14, 0.0  ;;  %v403_v24 = vmin.f32 %v347_v19, 0.0  ;;  %vm395_vm1 = vcmp.gt.f32.partialorder %v347_v19, 0.0  ;;  %vm393_vm4 = vcmp.gt.f32.partialorder %v1688_v14, 0.0 }
  0xc7   :  { %v402_v23 = vmin.f32 %v1690_v18, 0.0  ;;  %v404_v25 = vmin.f32 %v361_v22, 0.0  ;;  %vm396_vm3 = vcmp.gt.f32.partialorder %v361_v22, 0.0  ;;  %vm394_vm6 = vcmp.gt.f32.partialorder %v1690_v18, 0.0 }
  0xc8   :  { %v415_v26 = vmul.f32 1.442695, %v403_v24  ;;  %v411_v27 = vmul.f32 1.442695, %v401_v21  ;;  %v1400_v34 = vpop.eup %1399 }
  0xc9   :  { %v417_v28 = vmul.f32 1.442695, %v404_v25  ;;  %v413_v29 = vmul.f32 1.442695, %v402_v23  ;;  %v1402_v36 = vpop.eup %1401  ;;  %v1097_v39 = vadd.f32 -1.0, %v1400_v34  ;;  %v1377_v23 = vld [vmem:[#allocation11 + $0x28] sm:$0xff] }
  0xca   :  { %1403 = vpow2.f32 %v415_v26  ;;  %v1098_v42 = vadd.f32 -1.0, %v1402_v36 }
  0xcb   :  { %v374_v30 = vpop.f32.mrf.mxu2  ;;  %1405 = vpow2.f32 %v417_v28  ;;  %v431_v48 = vsel %vm391_vm0, %v345_v5, %v1097_v39  ;;  %v1368_v5 = vld [vmem:[#allocation10 + $0x20] sm:$0xff] }
  0xcc   :  { %v375_v31 = vadd.f32 %v374_v30, %v163_v9  ;;  %v388_v32 = vpop.f32.mrf.mxu3  ;;  %1407 = vpow2.f32 %v411_v27  ;;  %v432_v51 = vsel %vm392_vm2, %v359_v7, %v1098_v42  ;;  %843 = vmatpush.bf16.msra.mxu0 %v1368_v5  ;;  %v1366_v7 = vld [vmem:[#allocation10 + $0x10] sm:$0xff]  ;;  %v1376_v27 = vld [vmem:[#allocation11 + $0x20] sm:$0xff]  ;;  %v1375_v42 = vld [vmem:[#allocation11 + $0x18] sm:$0xff] }
  0xcd   :  { %v389_v33 = vadd.f32 %v388_v32, %v164_v11  ;;  %1409 = vpow2.f32 %v413_v29  ;;  %v1364_v11 = vld [vmem:[#allocation10] sm:$0xff] }
  0xce   :  { %v405_v35 = vmin.f32 %v375_v31, 0.0  ;;  %vm397_vm5 = vcmp.gt.f32.partialorder %v375_v31, 0.0 }
  0xcf   :  { %v406_v37 = vmin.f32 %v389_v33, 0.0  ;;  %vm398_vm7 = vcmp.gt.f32.partialorder %v389_v33, 0.0 }
  0xd0   :  { %v419_v38 = vmul.f32 1.442695, %v405_v35  ;;  %v1404_v41 = vpop.eup %1403  ;;  %844 = vmatpush.bf16.msra.mxu0 %v1367_v6 }
  0xd1   :  { %v421_v40 = vmul.f32 1.442695, %v406_v37  ;;  %v1406_v43 = vpop.eup %1405  ;;  %v1101_v44 = vadd.f32 -1.0, %v1404_v41 }
  0xd2   :  { %1411 = vpow2.f32 %v419_v38  ;;  %v1408_v45 = vpop.eup %1407  ;;  %v1102_v46 = vadd.f32 -1.0, %v1406_v43  ;;  %v1374_v43 = vld [vmem:[#allocation11 + $0x10] sm:$0xff] }
  0xd3   :  { %1413 = vpow2.f32 %v421_v40  ;;  %v1410_v47 = vpop.eup %1409  ;;  %v435_v49 = vsel %vm395_vm1, %v347_v19, %v1101_v44  ;;  %v1099_v53 = vadd.f32 -1.0, %v1408_v45  ;;  %v1373_v44 = vld [vmem:[#allocation11 + $0x8] sm:$0xff]  ;;  %v1372_v45 = vld [vmem:[#allocation11] sm:$0xff] }
  0xd4   :  { %v439_v50 = vpack.c.bf16 %v435_v49, %v431_v48  ;;  %v436_v52 = vsel %vm396_vm3, %v361_v22, %v1102_v46  ;;  %v1100_v56 = vadd.f32 -1.0, %v1410_v47  ;;  %845 = vmatpush.bf16.msra.mxu0 %v1366_v7  ;;  %v1397_v47 = vld [vmem:[%s1719_s6] ss:$0 sm:$0xff] }
  0xd5   :  { %v440_v54 = vpack.c.bf16 %v436_v52, %v432_v51  ;;  %v433_v60 = vsel %vm393_vm4, %v1688_v14, %v1099_v53  ;;  %v1379_v14 = vld [vmem:[#allocation11 + $0x38] sm:$0xff] }
  0xd6   :  { %711 = vmatmul.bf16.vlgmr.msrb.gmra.mxu0 %v439_v50  ;;  %v434_v63 = vsel %vm394_vm6, %v1690_v18, %v1100_v56  ;;  %925 = vmatpush.bf16.msra.mxu1 %v1379_v14 }
  0xd7   :  { %725 = vmatmul.bf16.vlgmr.msrb.gmra.mxu1 %v440_v54 }
  0xd8   :  { %v1412_v55 = vpop.eup %1411  ;;  %846 = vmatpush.bf16.msra.mxu0 %v1365_v8 }
  0xd9   :  { %v1414_v57 = vpop.eup %1413  ;;  %v1103_v58 = vadd.f32 -1.0, %v1412_v55  ;;  %v1398_v55 = vld [vmem:[%s1721_s8] ss:$0 sm:$0xff] }
  0xda   :  { %v1104_v59 = vadd.f32 -1.0, %v1414_v57  ;;  %926 = vmatpush.bf16.msra.mxu1 %v1378_v16 }
  0xdb   :  { %v437_v61 = vsel %vm397_vm5, %v375_v31, %v1103_v58 }
  0xdc   :  { %v441_v62 = vpack.c.bf16 %v437_v61, %v433_v60  ;;  %v438_v0 = vsel %vm398_vm7, %v389_v33, %v1104_v59  ;;  %847 = vmatpush.bf16.msra.mxu0 %v1364_v11 }
  0xdd   :  { %v442_v1 = vpack.c.bf16 %v438_v0, %v434_v63 }
  0xde   :  { %739 = vmatmul.bf16.vlgmr.msrb.gmra.mxu2 %v441_v62  ;;  %927 = vmatpush.bf16.msra.mxu1 %v1377_v23 }
  0xdf   :  { %753 = vmatmul.bf16.vlgmr.msrb.gmra.mxu3 %v442_v1 }
  0xe2   :  { %928 = vmatpush.bf16.msra.mxu1 %v1376_v27 }
  0xe6   :  { %929 = vmatpush.bf16.msra.mxu1 %v1375_v42 }
  0xea   :  { %930 = vmatpush.bf16.msra.mxu1 %v1374_v43 }
  0xee   :  { %931 = vmatpush.bf16.msra.mxu1 %v1373_v44 }
  0xf2   :  { %932 = vmatpush.bf16.msra.mxu1 %v1372_v45 }
 0x153   :  { %v712_v9 = vpop.f32.mrf.mxu0 }
 0x154   :  { %v713_v12 = vadd.f32 %v1396_v10, %v712_v9  ;;  %v726_v13 = vpop.f32.mrf.mxu1 }
 0x156   :  { %v727_v15 = vadd.f32 %v726_v13, %v713_v12 }
 0x15b   :  { %v714_v17 = vpop.f32.mrf.mxu0 }
 0x15c   :  { %v715_v21 = vadd.f32 %v1396_v10, %v714_v17  ;;  %v728_v25 = vpop.f32.mrf.mxu1 }
 0x15e   :  { %v729_v26 = vadd.f32 %v728_v25, %v715_v21 }
 0x161   :  { %v740_v18 = vpop.f32.mrf.mxu2 }
 0x162   :  { %v741_v19 = vadd.f32 %v740_v18, %v727_v15  ;;  %v754_v20 = vpop.f32.mrf.mxu3 }
 0x164   :  { %v755_v22 = vadd.f32 %v754_v20, %v741_v19 }
 0x166   :  { %v761_v24 = vmin.f32 %v755_v22, 0.0  ;;  %vm759_vm8 = vcmp.gt.f32.partialorder %v755_v22, 0.0 }
 0x168   :  { %v763_v29 = vmul.f32 1.442695, %v761_v24 }
 0x169   :  { %v742_v28 = vpop.f32.mrf.mxu2 }
 0x16a   :  { %v743_v30 = vadd.f32 %v742_v28, %v729_v26  ;;  %v756_v31 = vpop.f32.mrf.mxu3  ;;  %1415 = vpow2.f32 %v763_v29 }
 0x16c   :  { %v757_v32 = vadd.f32 %v756_v31, %v743_v30 }
 0x16e   :  { %v762_v33 = vmin.f32 %v757_v32, 0.0  ;;  %vm760_vm9 = vcmp.gt.f32.partialorder %v757_v32, 0.0 }
 0x170   :  { %v765_v34 = vmul.f32 1.442695, %v762_v33  ;;  %v1416_v35 = vpop.eup %1415 }
 0x171   :  { %v1233_v36 = vadd.f32 -1.0, %v1416_v35 }
 0x172   :  { %1417 = vpow2.f32 %v765_v34 }
 0x173   :  { %v769_v39 = vsel %vm759_vm8, %v755_v22, %v1233_v36 }
 0x178   :  { %v1418_v37 = vpop.eup %1417 }
 0x179   :  { %v1234_v38 = vadd.f32 -1.0, %v1418_v37 }
 0x17b   :  { %v770_v40 = vsel %vm760_vm9, %v757_v32, %v1234_v38 }
 0x17c   :  { %v771_v41 = vpack.c.bf16 %v770_v40, %v769_v39 }
 0x17e   :  { %848 = vmatmul.bf16.vlgmr.msra.gmra.mxu0 %v771_v41 }
 0x1fb   :  { %v849_v46 = vpop.f32.mrf.mxu0 }
 0x1fc   :  { %v850_v48 = vadd.f32 %v1397_v47, %v849_v46 }
 0x1fe   :  { %v854_v51 = vmax.f32 %v850_v48, 0.0 }
 0x203   :  { %v851_v49 = vpop.f32.mrf.mxu0 }
 0x204   :  { %v852_v50 = vadd.f32 %v1397_v47, %v851_v49 }
 0x206   :  { %v855_v52 = vmax.f32 %v852_v50, 0.0 }
 0x208   :  { %v856_v53 = vpack.c.bf16 %v855_v52, %v854_v51 }
 0x20a   :  { %933 = vmatmul.bf16.vlgmr.msra.gmra.mxu1 %v856_v53 }
 0x287   :  { %v934_v54 = vpop.f32.mrf.mxu1 }
 0x288   :  { %v935_v57 = vadd.f32 %v1398_v55, %v934_v54 }
 0x28f   :  { %v936_v56 = vpop.f32.mrf.mxu1 }
 0x290   :  { %v937_v58 = vadd.f32 %v1398_v55, %v936_v56 }
 0x292   :  { %v1383_v59 = vpack.c.bf16 %v937_v58, %v935_v57 }
 0x294   :  { %1384 = vst [vmem:[#allocation13] sm:$0xff] %v1383_v59  }
 0x295   :  { %955 = dma.vmem_to_hbm [thread:$0]  %s948_s22, 128, %s950_s26, [#allocation4], %s1601_s1, %s1601_s1, %s1602_s24  }
 0x296   :  { %1595 = dma.done.wait [#allocation4], 128  }
 0x297   :  { %1596 = vsyncadd [#allocation4], 4294967168 }
 0x298   :  { %960 = vsyncpa [#allocation3], 1 }
 0x299   :  { %961 = vsyncpa [#allocation6], 1 }
 0x29a   :  { %962 = vsyncpa [#allocation9], 1 }
 0x29b   :  { %963 = vsyncpa [#allocation12], 1 }
 0x29c   :  { %964 = vsyncpa [#allocation4], 1 }

</bundles_post_ra>
